<compile_context>
chip_gen: v6e
topology: v6e:2x2x1
jax: 0.10.0
libtpu: 0.0.40
codegen_flags: <defaults>
</compile_context>

<pallas_src>
import jax
import jax.numpy as jnp
from jax.experimental import pallas as pl
from jax.experimental.pallas import tpu as pltpu

BN_EPS = 1e-5


def _round_up(x, m):
    return ((x + m - 1) // m) * m


# ----------------------------------------------------------------------------- 
# Kernel: one batch tile, all weights resident.
# -----------------------------------------------------------------------------
def actor_kernel(x_ref, w1_ref, w2_ref, w3_ref, w4_ref, b_ref, out_ref):
    action_dim = w4_ref.shape[1]

    x = x_ref[...]                       # (TB, state_dim), already f32

    # Packed biases: row 0..2 -> (folded) b1,b2,b3 at hidden width,
    # row 3 -> b4 zero-padded to hidden width (only first action_dim lanes used).
    b1 = b_ref[0:1, :]
    b2 = b_ref[1:2, :]
    b3 = b_ref[2:3, :]
    b4 = b_ref[3:4, 0:action_dim]

    # fc1 (BN1 folded) -> relu      (dropout = identity at inference)
    h = jnp.dot(x, w1_ref[...], preferred_element_type=jnp.float32) + b1
    h = jnp.maximum(h, 0.0)

    # fc2 (BN2 folded) -> relu
    h = jnp.dot(h, w2_ref[...], preferred_element_type=jnp.float32) + b2
    h = jnp.maximum(h, 0.0)

    # fc3 -> relu
    h = jnp.dot(h, w3_ref[...], preferred_element_type=jnp.float32) + b3
    h = jnp.maximum(h, 0.0)

    # fc4 -> tanh
    a = jnp.tanh(
        jnp.dot(h, w4_ref[...], preferred_element_type=jnp.float32) + b4
    )  # (TB, action_dim)

    # column 0 stays tanh (position size); all other columns get sigmoid.
    # Wrapper slices columns 0:3 -> matches torch.cat([a0, sig(a1), sig(a2)]).
    col = jax.lax.broadcasted_iota(jnp.int32, a.shape, 1)
    out_ref[...] = jnp.where(col == 0, a, jax.nn.sigmoid(a)).astype(out_ref.dtype)


# -----------------------------------------------------------------------------
# Wrapper: batch grid, weights fetched once (index_map -> (0, 0)).
# -----------------------------------------------------------------------------
def actor_forward(state, kernel_params, *, block_b=512):
    w1, w2, w3, w4, b_pack = kernel_params
    B, state_dim = state.shape
    hidden = w1.shape[1]
    action_dim = w4.shape[1]

    # Batch tile: multiple of 8 sublanes, clamped to the (padded) batch.
    tb = min(block_b, _round_up(B, 8))
    Bp = _round_up(B, tb)
    if Bp != B:
        state = jnp.pad(state, ((0, Bp - B), (0, 0)))

    grid = (Bp // tb,)

    out = pl.pallas_call(
        actor_kernel,
        out_shape=jax.ShapeDtypeStruct((Bp, action_dim), jnp.float32),
        grid=grid,
        in_specs=[
            pl.BlockSpec((tb, state_dim), lambda i: (i, 0)),       # state tile
            pl.BlockSpec((state_dim, hidden), lambda i: (0, 0)),   # W1 (resident)
            pl.BlockSpec((hidden, hidden), lambda i: (0, 0)),      # W2 (resident)
            pl.BlockSpec((hidden, hidden), lambda i: (0, 0)),      # W3 (resident)
            pl.BlockSpec((hidden, action_dim), lambda i: (0, 0)),  # W4 (resident)
            pl.BlockSpec((4, hidden), lambda i: (0, 0)),           # packed biases
        ],
        out_specs=pl.BlockSpec((tb, action_dim), lambda i: (i, 0)),
        compiler_params=pltpu.CompilerParams(
            dimension_semantics=("parallel",),   # shards batch tiles across TCs on v7x
        ),
    )(state, w1, w2, w3, w4, b_pack)

    # Module returns only [tanh(a0), sigmoid(a1), sigmoid(a2)]; slice here
    # (free layout plumbing) and drop any batch padding.
    return out[:B, :3]


# -----------------------------------------------------------------------------
# Parameter construction (mirrors the PyTorch module) + offline BN folding.
# -----------------------------------------------------------------------------
def init_raw_params(key, state_dim, action_dim, hidden_dim):
    """Raw parameters with PyTorch-style init.

    Linear weights are returned already transposed to [in_dim, out_dim];
    1-D params (biases / BN stats) are shape [dim].
    """
    ks = jax.random.split(key, 8)

    def lin(kw, kb, fan_in, fan_out, bound=None):
        if bound is None:
            bound = 1.0 / jnp.sqrt(fan_in)
        w_t = jax.random.uniform(kw, (fan_in, fan_out), jnp.float32, -bound, bound)
        b = jax.random.uniform(kb, (fan_out,), jnp.float32, -bound, bound)
        return w_t, b

    w1, b1 = lin(ks[0], ks[1], state_dim, hidden_dim)
    w2, b2 = lin(ks[2], ks[3], hidden_dim, hidden_dim)
    w3, b3 = lin(ks[4], ks[5], hidden_dim, hidden_dim)
    w4, b4 = lin(ks[6], ks[7], hidden_dim, action_dim, bound=0.003)

    # BatchNorm1d defaults: gamma=1, beta=0, running_mean=0, running_var=1.
    # (Use slightly non-trivial stats so the folding is actually exercised.)
    g1 = jnp.full((hidden_dim,), 1.1, jnp.float32)
    be1 = jnp.full((hidden_dim,), 0.05, jnp.float32)
    m1 = jnp.full((hidden_dim,), 0.02, jnp.float32)
    v1 = jnp.full((hidden_dim,), 0.9, jnp.float32)
    g2 = jnp.full((hidden_dim,), 0.95, jnp.float32)
    be2 = jnp.full((hidden_dim,), -0.03, jnp.float32)
    m2 = jnp.full((hidden_dim,), -0.01, jnp.float32)
    v2 = jnp.full((hidden_dim,), 1.2, jnp.float32)

    return (w1, b1, g1, be1, m1, v1,
            w2, b2, g2, be2, m2, v2,
            w3, b3, w4, b4)


def fold_params(raw):
    """Fold eval-mode BatchNorm into fc1/fc2 and pack biases (done once, offline)."""
    (w1, b1, g1, be1, m1, v1,
     w2, b2, g2, be2, m2, v2,
     w3, b3, w4, b4) = raw

    hidden_dim = w1.shape[1]
    action_dim = w4.shape[1]
    assert action_dim >= 3, "module slices actions[:, 0:3]"
    assert action_dim <= hidden_dim, "bias packing assumes action_dim <= hidden_dim"

    s1 = g1 * jax.lax.rsqrt(v1 + BN_EPS)            # per-output-column scale
    w1f = w1 * s1[None, :]
    b1f = (b1 - m1) * s1 + be1

    s2 = g2 * jax.lax.rsqrt(v2 + BN_EPS)
    w2f = w2 * s2[None, :]
    b2f = (b2 - m2) * s2 + be2

    b4p = jnp.zeros((hidden_dim,), jnp.float32).at[:action_dim].set(b4)
    b_pack = jnp.stack([b1f, b2f, b3, b4p], axis=0)  # (4, hidden_dim)

    # TODO(synk): for very large batches on v6e/v7x, cast weights/activations
    #             to bf16 (keep f32 accumulation) to halve DMA bytes.
    return (w1f, w2f, w3, w4, b_pack)


# -----------------------------------------------------------------------------
# Pure-JAX reference on the RAW (un-folded) parameters — eval-mode forward.
# -----------------------------------------------------------------------------
def actor_reference(state, raw):
    (w1, b1, g1, be1, m1, v1,
     w2, b2, g2, be2, m2, v2,
     w3, b3, w4, b4) = raw
    h = state @ w1 + b1
    h = jnp.maximum((h - m1) * jax.lax.rsqrt(v1 + BN_EPS) * g1 + be1, 0.0)
    h = h @ w2 + b2
    h = jnp.maximum((h - m2) * jax.lax.rsqrt(v2 + BN_EPS) * g2 + be2, 0.0)
    h = jnp.maximum(h @ w3 + b3, 0.0)
    a = jnp.tanh(h @ w4 + b4)
    return jnp.concatenate(
        [a[:, 0:1], jax.nn.sigmoid(a[:, 1:2]), jax.nn.sigmoid(a[:, 2:3])], axis=1
    )


if __name__ == "__main__":
    key = jax.random.PRNGKey(0)
    kp, kx = jax.random.split(key)

    B, STATE_DIM, ACTION_DIM, HIDDEN_DIM = 8, 16, 4, 32

    raw = init_raw_params(kp, STATE_DIM, ACTION_DIM, HIDDEN_DIM)
    kernel_params = fold_params(raw)
    state = jax.random.normal(kx, (B, STATE_DIM), jnp.float32)

    out = actor_forward(state, kernel_params)
    out = jax.block_until_ready(out)

    ref = actor_reference(state, raw)
    assert out.shape == (B, 3), out.shape
    assert jnp.allclose(out, ref, atol=1e-5, rtol=1e-5), "mismatch vs. reference"

    print("KERNEL_OK")
</pallas_src>

<mosaic_0001>
module attributes {stable_mosaic.version = 11 : i64} {
  func.func @actor_kernel(%arg0: i32, %arg1: memref<8x16xf32, #tpu.memory_space<vmem>>, %arg2: memref<16x32xf32, #tpu.memory_space<vmem>>, %arg3: memref<32x32xf32, #tpu.memory_space<vmem>>, %arg4: memref<32x32xf32, #tpu.memory_space<vmem>>, %arg5: memref<32x4xf32, #tpu.memory_space<vmem>>, %arg6: memref<4x32xf32, #tpu.memory_space<vmem>>, %arg7: memref<8x4xf32, #tpu.memory_space<vmem>>) attributes {dimension_semantics = [#tpu.dimension_semantics<parallel>], iteration_bounds = array<i64: 1>, scalar_prefetch = 0 : i64, scratch_operands = 0 : i64, tpu.core_type = #tpu.core_type<tc>, window_params = [{transform_indices = @transform_0, window_bounds = array<i64: 8, 16>}, {pipeline_mode = #tpu.pipeline_mode<synchronous>, transform_indices = @transform_1, window_bounds = array<i64: 16, 32>}, {pipeline_mode = #tpu.pipeline_mode<synchronous>, transform_indices = @transform_2, window_bounds = array<i64: 32, 32>}, {pipeline_mode = #tpu.pipeline_mode<synchronous>, transform_indices = @transform_3, window_bounds = array<i64: 32, 32>}, {pipeline_mode = #tpu.pipeline_mode<synchronous>, transform_indices = @transform_4, window_bounds = array<i64: 32, 4>}, {pipeline_mode = #tpu.pipeline_mode<synchronous>, transform_indices = @transform_5, window_bounds = array<i64: 4, 32>}, {transform_indices = @transform_6, window_bounds = array<i64: 8, 4>}]} {
    %c0 = arith.constant 0 : index
    %c0_0 = arith.constant 0 : index
    %0 = vector.load %arg1[%c0, %c0_0] : memref<8x16xf32, #tpu.memory_space<vmem>>, vector<8x16xf32>
    %c0_1 = arith.constant 0 : index
    %c0_2 = arith.constant 0 : index
    %1 = vector.load %arg6[%c0_1, %c0_2] : memref<4x32xf32, #tpu.memory_space<vmem>>, vector<1x32xf32>
    %c1 = arith.constant 1 : index
    %c0_3 = arith.constant 0 : index
    %2 = vector.load %arg6[%c1, %c0_3] : memref<4x32xf32, #tpu.memory_space<vmem>>, vector<1x32xf32>
    %c2 = arith.constant 2 : index
    %c0_4 = arith.constant 0 : index
    %3 = vector.load %arg6[%c2, %c0_4] : memref<4x32xf32, #tpu.memory_space<vmem>>, vector<1x32xf32>
    %c3 = arith.constant 3 : index
    %c0_5 = arith.constant 0 : index
    %4 = vector.load %arg6[%c3, %c0_5] : memref<4x32xf32, #tpu.memory_space<vmem>>, vector<1x4xf32>
    %c0_6 = arith.constant 0 : index
    %c0_7 = arith.constant 0 : index
    %5 = vector.load %arg2[%c0_6, %c0_7] : memref<16x32xf32, #tpu.memory_space<vmem>>, vector<16x32xf32>
    %cst = arith.constant dense<0.000000e+00> : vector<8x32xf32>
    %6 = tpu.matmul %0, %5, %cst {dimension_numbers = #tpu.dot_dimension_numbers<[1], [0], [0], [1], [0, 0, 1, 1], [], []>} : vector<8x16xf32>, vector<16x32xf32>, vector<8x32xf32> -> vector<8x32xf32>
    %7 = vector.broadcast %1 : vector<1x32xf32> to vector<8x32xf32>
    %8 = arith.addf %6, %7 : vector<8x32xf32>
    %cst_8 = arith.constant 0.000000e+00 : f32
    %9 = vector.broadcast %cst_8 : f32 to vector<8x32xf32>
    %10 = arith.maximumf %8, %9 : vector<8x32xf32>
    %c0_9 = arith.constant 0 : index
    %c0_10 = arith.constant 0 : index
    %11 = vector.load %arg3[%c0_9, %c0_10] : memref<32x32xf32, #tpu.memory_space<vmem>>, vector<32x32xf32>
    %cst_11 = arith.constant dense<0.000000e+00> : vector<8x32xf32>
    %12 = tpu.matmul %10, %11, %cst_11 {dimension_numbers = #tpu.dot_dimension_numbers<[1], [0], [0], [1], [0, 0, 1, 1], [], []>} : vector<8x32xf32>, vector<32x32xf32>, vector<8x32xf32> -> vector<8x32xf32>
    %13 = vector.broadcast %2 : vector<1x32xf32> to vector<8x32xf32>
    %14 = arith.addf %12, %13 : vector<8x32xf32>
    %cst_12 = arith.constant 0.000000e+00 : f32
    %15 = vector.broadcast %cst_12 : f32 to vector<8x32xf32>
    %16 = arith.maximumf %14, %15 : vector<8x32xf32>
    %c0_13 = arith.constant 0 : index
    %c0_14 = arith.constant 0 : index
    %17 = vector.load %arg4[%c0_13, %c0_14] : memref<32x32xf32, #tpu.memory_space<vmem>>, vector<32x32xf32>
    %cst_15 = arith.constant dense<0.000000e+00> : vector<8x32xf32>
    %18 = tpu.matmul %16, %17, %cst_15 {dimension_numbers = #tpu.dot_dimension_numbers<[1], [0], [0], [1], [0, 0, 1, 1], [], []>} : vector<8x32xf32>, vector<32x32xf32>, vector<8x32xf32> -> vector<8x32xf32>
    %19 = vector.broadcast %3 : vector<1x32xf32> to vector<8x32xf32>
    %20 = arith.addf %18, %19 : vector<8x32xf32>
    %cst_16 = arith.constant 0.000000e+00 : f32
    %21 = vector.broadcast %cst_16 : f32 to vector<8x32xf32>
    %22 = arith.maximumf %20, %21 : vector<8x32xf32>
    %c0_17 = arith.constant 0 : index
    %c0_18 = arith.constant 0 : index
    %23 = vector.load %arg5[%c0_17, %c0_18] : memref<32x4xf32, #tpu.memory_space<vmem>>, vector<32x4xf32>
    %cst_19 = arith.constant dense<0.000000e+00> : vector<8x4xf32>
    %24 = tpu.matmul %22, %23, %cst_19 {dimension_numbers = #tpu.dot_dimension_numbers<[1], [0], [0], [1], [0, 0, 1, 1], [], []>} : vector<8x32xf32>, vector<32x4xf32>, vector<8x4xf32> -> vector<8x4xf32>
    %25 = vector.broadcast %4 : vector<1x4xf32> to vector<8x4xf32>
    %26 = arith.addf %24, %25 : vector<8x4xf32>
    %27 = math.tanh %26 : vector<8x4xf32>
    %28 = tpu.iota {dimensions = array<i32: 1>} : vector<8x4xi32>
    %c0_i32 = arith.constant 0 : i32
    %29 = vector.broadcast %c0_i32 : i32 to vector<8x4xi32>
    %30 = arith.cmpi eq, %28, %29 : vector<8x4xi32>
    %31 = arith.negf %27 : vector<8x4xf32>
    %32 = math.exp %31 : vector<8x4xf32>
    %cst_20 = arith.constant 1.000000e+00 : f32
    %33 = vector.broadcast %cst_20 : f32 to vector<8x4xf32>
    %34 = arith.addf %33, %32 : vector<8x4xf32>
    %35 = arith.divf %33, %34 : vector<8x4xf32>
    %36 = arith.select %30, %27, %35 : vector<8x4xi1>, vector<8x4xf32>
    %c0_21 = arith.constant 0 : index
    %c0_22 = arith.constant 0 : index
    %37 = vector.load %arg7[%c0_21, %c0_22] : memref<8x4xf32, #tpu.memory_space<vmem>>, vector<8x4xf32>
    tpu.vector_store %arg7[%c0_21, %c0_22], %36 {strides = array<i32>} : memref<8x4xf32, #tpu.memory_space<vmem>>, vector<8x4xf32>,
    return
  }
  func.func @transform_0(%arg0: i32) -> (i32, i32) {
    %c0_i32 = arith.constant 0 : i32
    %c0_i32_0 = arith.constant 0 : i32
    return %arg0, %c0_i32 : i32, i32
  }
  func.func @transform_1(%arg0: i32) -> (i32, i32) {
    %c0_i32 = arith.constant 0 : i32
    %c0_i32_0 = arith.constant 0 : i32
    %c0_i32_1 = arith.constant 0 : i32
    return %c0_i32, %c0_i32_0 : i32, i32
  }
  func.func @transform_2(%arg0: i32) -> (i32, i32) {
    %c0_i32 = arith.constant 0 : i32
    %c0_i32_0 = arith.constant 0 : i32
    %c0_i32_1 = arith.constant 0 : i32
    return %c0_i32, %c0_i32_0 : i32, i32
  }
  func.func @transform_3(%arg0: i32) -> (i32, i32) {
    %c0_i32 = arith.constant 0 : i32
    %c0_i32_0 = arith.constant 0 : i32
    %c0_i32_1 = arith.constant 0 : i32
    return %c0_i32, %c0_i32_0 : i32, i32
  }
  func.func @transform_4(%arg0: i32) -> (i32, i32) {
    %c0_i32 = arith.constant 0 : i32
    %c0_i32_0 = arith.constant 0 : i32
    %c0_i32_1 = arith.constant 0 : i32
    return %c0_i32, %c0_i32_0 : i32, i32
  }
  func.func @transform_5(%arg0: i32) -> (i32, i32) {
    %c0_i32 = arith.constant 0 : i32
    %c0_i32_0 = arith.constant 0 : i32
    %c0_i32_1 = arith.constant 0 : i32
    return %c0_i32, %c0_i32_0 : i32, i32
  }
  func.func @transform_6(%arg0: i32) -> (i32, i32) {
    %c0_i32 = arith.constant 0 : i32
    %c0_i32_0 = arith.constant 0 : i32
    return %arg0, %c0_i32 : i32, i32
  }
}

</mosaic_0001>

<bundles_post_ra>
// kernel: tpu_custom_call.1
= control target key start
LH: loop header
LB: loop body
LE: loop exit
PB: predicated region body
PF: predicated region fallthrough
CT: control target
= control target key end

     0   :  { %11 = vsyncpa [#allocation3], 0  ;;  %s654_s0 = inlined_call_operand.hbm [shape: f32[8,16], index: 0, kind: input, shape index: {}]   ;;  %s655_s1 = inlined_call_operand.hbm [shape: f32[16,32], index: 1, kind: input, shape index: {}]   ;;  %s656_s2 = inlined_call_operand.vmem [shape: f32[32,32], index: 2, kind: input, shape index: {}]   ;;  %s657_s3 = inlined_call_operand.hbm [shape: f32[32,32], index: 3, kind: input, shape index: {}]   ;;  %s658_s4 = inlined_call_operand.vmem [shape: f32[32,4], index: 4, kind: input, shape index: {}]   ;;  %s659_s5 = inlined_call_operand.vmem [shape: f32[4,32], index: 5, kind: input, shape index: {}]   ;;  %s660_s6 = inlined_call_operand.vmem [shape: f32[8,4], index: 6, kind: output, shape index: {}]  }
   0x1   :  { %12 = vsyncpa [#allocation5], 0  ;;  %s557_s21 = smov [#allocation4]  }
   0x2   :  { %s28_s22 = sshll.u32 %s557_s21, 4  ;;  %s29_s22 = int_to_ptr.vmem [resolvable:$true] %s28_s22 }
   0x3   :  { %s501_s23 = scalar_lea.vmem %s29_s22, 256  ;;  %p506_p1 = scmp.lt.s32.totalorder %s29_s22, %s29_s22 }
   0x4   :  { %p502_p0 = scmp.ne.s32.totalorder %s29_s22, %s501_s23  ;;  %p507_p2 = scmp.lt.s32.totalorder %s501_s23, %s501_s23 }
   0x6   :  { %p508_p3 = por %p507_p2, %p506_p1 }
   0x8   :  { %p509_p4 = pnand %p508_p3, %p502_p0 }
   0xa   :  { %512 = shalt.err (!%p509_p4)
}
   0xb   :  { %s558_s24 = smov 128   ;;  %s559_s25 = smov 8  }
   0xc   :  { %34 = dma.hbm_to_vmem [thread:$0]  %s655_s1, 256, %s29_s22, [#allocation5], %s558_s24, %s558_s24, %s559_s25  }
   0xd   :  { %s560_s28 = smov [#allocation2]   ;;  %s561_s30 = smov [#allocation6]  }
   0xe   :  { %s19_s29 = sshll.u32 %s560_s28, 4  ;;  %s42_s7 = sshll.u32 %s561_s30, 4  ;;  %s20_s29 = int_to_ptr.vmem [resolvable:$true] %s19_s29  ;;  %s43_s7 = int_to_ptr.vmem [resolvable:$true] %s42_s7 }
   0xf   :  { %s521_s8 = scalar_lea.vmem %s20_s29, 128  ;;  %p526_p6 = scmp.lt.s32.totalorder %s20_s29, %s20_s29 }
  0x10   :  { %p522_p5 = scmp.ne.s32.totalorder %s20_s29, %s521_s8  ;;  %p527_p7 = scmp.lt.s32.totalorder %s521_s8, %s521_s8 }
  0x12   :  { %p528_p8 = por %p527_p7, %p526_p6 }
  0x14   :  { %p529_p9 = pnand %p528_p8, %p522_p5 }
  0x16   :  { %532 = shalt.err (!%p529_p9)
}
  0x17   :  { %22 = dma.hbm_to_vmem [thread:$0]  %s654_s0, 128, %s20_s29, [#allocation3]  }
  0x18   :  { %s541_s11 = scalar_lea.vmem %s43_s7, 512  ;;  %p546_p11 = scmp.lt.s32.totalorder %s43_s7, %s43_s7 }
  0x19   :  { %p542_p10 = scmp.ne.s32.totalorder %s43_s7, %s541_s11  ;;  %p547_p12 = scmp.lt.s32.totalorder %s541_s11, %s541_s11 }
  0x1b   :  { %p548_p13 = por %p547_p12, %p546_p11 }
  0x1d   :  { %p549_p0 = pnand %p548_p13, %p542_p10 }
  0x1f   :  { %552 = shalt.err (!%p549_p0)
}
  0x20   :  { %48 = dma.hbm_to_vmem [thread:$0]  %s657_s3, 512, %s43_s7, [#allocation5], %s558_s24, %s558_s24, %s559_s25  }
  0x21   :  { %553 = dma.done.wait [#allocation3], 128  }
  0x22   :  { %554 = vsyncadd [#allocation3], 4294967168 }
  0x23   :  { %555 = dma.done.wait [#allocation5], 768  }
  0x24   :  { %556 = vsyncadd [#allocation5], 4294966528  ;;  %v562_v0 = vmov 0.0   ;;  %vm563_vm0 = vmmov 0   ;;  %v68_v1 = vld [vmem:[#allocation4 + $0x8] sm:$0xff]  ;;  %v67_v2 = vld [vmem:[#allocation4] sm:$0xff]  ;;  %v395_v39 = vlaneseq }
  0x25   :  { %440 = vmatprep.subr.mxu0 %v562_v0  ;;  %444 = vmatprep.mubr.msk.f32.mxu0 %vm563_vm0, %v562_v0  ;;  %v62_v3 = vld [vmem:[#allocation2] sm:$0xff]  ;;  %vm73_vm1 = vcmask 130048   ;;  %v151_v4 = vld [vmem:[%s656_s2 + $0x18] sm:$0xff]  ;;  %v150_v5 = vld [vmem:[%s656_s2 + $0x10] sm:$0xff]  ;;  %vm156_vm2 = vcmask 261120   ;;  %vm405_vm4 = vcmask 31744  }
  0x26   :  { %447 = vmatprep.subr.mxu1 %v562_v0  ;;  %455 = vmatprep.mubr.msk.f32.mxu1 %vm563_vm0, %v562_v0  ;;  %v149_v6 = vld [vmem:[%s656_s2 + $0x8] sm:$0xff]  ;;  %v148_v7 = vld [vmem:[%s656_s2] sm:$0xff]  ;;  %v234_v8 = vld [vmem:[#allocation6 + $0x18] sm:$0xff]  ;;  %v396_v40 = vand.u32 127, %v395_v39 }
  0x27   :  { %441 = vmatpush3.msra.mxu0 %v68_v1  ;;  %448 = vmatpush3.msra.mxu1 %v151_v4  ;;  %v413_v9 = vld [vmem:[%s659_s5] ss:$0 sm:$0xff]  ;;  %v233_v14 = vld [vmem:[#allocation6 + $0x10] sm:$0xff]  ;;  %v231_v16 = vld [vmem:[#allocation6] sm:$0xff] }
  0x28   :  { %442 = vmatprep.subr.mxu0 %v562_v0  ;;  %449 = vmatprep.subr.mxu1 %v562_v0  ;;  %v232_v15 = vld [vmem:[#allocation6 + $0x8] sm:$0xff]  ;;  %v316_v17 = vld [vmem:[%s658_s4 + $0x18] sm:$0xff]  ;;  %v315_v23 = vld [vmem:[%s658_s4 + $0x10] sm:$0xff]  ;;  %vm397_vm3 = vcmp.eq.s32.totalorder %v396_v40, 0 }
  0x29   :  { %443 = vmatpush3.msra.mxu0 %v67_v2  ;;  %450 = vmatpush3.msra.mxu1 %v150_v5  ;;  %v415_v18 = vld [vmem:[%s659_s5 + $0x1] ss:$0 sm:$0xff]  ;;  %v314_v24 = vld [vmem:[%s658_s4 + $0x8] sm:$0xff]  ;;  %v417_v26 = vld [vmem:[%s659_s5 + $0x2] ss:$0 sm:$0xff] }
  0x2a   :  { %445 = vmatmul.mubr.msk.f32.vlgmr.msra.gmra.mxu0 %vm73_vm1, %v62_v3  ;;  %458 = vmatprep.subr.mxu0 %v562_v0  ;;  %v313_v25 = vld [vmem:[%s658_s4] sm:$0xff] }
  0x2b   :  { %466 = vmatprep.mubr.msk.f32.mxu0 %vm563_vm0, %v562_v0  ;;  %451 = vmatprep.subr.mxu1 %v562_v0  ;;  %v419_v31 = vld [vmem:[%s659_s5 + $0x3] ss:$0 sm:$0xff] }
  0x2c   :  { %452 = vmatpush3.msra.mxu1 %v149_v6  ;;  %459 = vmatpush3.msra.mxu0 %v234_v8 }
  0x2d   :  { %453 = vmatprep.subr.mxu1 %v562_v0  ;;  %460 = vmatprep.subr.mxu0 %v562_v0 }
  0x2e   :  { %454 = vmatpush3.msra.mxu1 %v148_v7  ;;  %461 = vmatpush3.msra.mxu0 %v233_v14 }
  0x2f   :  { %469 = vmatprep.subr.mxu1 %v562_v0  ;;  %462 = vmatprep.subr.mxu0 %v562_v0 }
  0x30   :  { %463 = vmatpush3.msra.mxu0 %v232_v15 }
  0x31   :  { %464 = vmatprep.subr.mxu0 %v562_v0 }
  0x32   :  { %465 = vmatpush3.msra.mxu0 %v231_v16 }
  0xea   :  { %v143_v10 = vpop.f32.mrf.mxu0 }
  0xeb   :  { %v144_v11 = vadd.f32 %v413_v9, %v143_v10 }
  0xec   :  { %v446_v12 = vpop.f32.mrf.mxu0 }
  0xed   :  { %v147_v13 = vmax.f32 %v144_v11, 0.0 }
  0xef   :  { %456 = vmatmul.mubr.msk.f32.vlgmr.msra.gmra.mxu1 %vm156_vm2, %v147_v13 }
  0xf0   :  { %477 = vmatprep.mubr.msk.f32.mxu1 %vm563_vm0, %v562_v0  ;;  %470 = vmatpush3.msra.mxu1 %v316_v17 }
  0xf1   :  { %471 = vmatprep.subr.mxu1 %v562_v0 }
  0xf2   :  { %472 = vmatpush3.msra.mxu1 %v315_v23 }
  0xf3   :  { %473 = vmatprep.subr.mxu1 %v562_v0 }
  0xf4   :  { %474 = vmatpush3.msra.mxu1 %v314_v24 }
  0xf5   :  { %475 = vmatprep.subr.mxu1 %v562_v0 }
  0xf6   :  { %476 = vmatpush3.msra.mxu1 %v313_v25 }
 0x1af   :  { %v226_v19 = vpop.f32.mrf.mxu1 }
 0x1b0   :  { %v227_v20 = vadd.f32 %v415_v18, %v226_v19 }
 0x1b1   :  { %v457_v21 = vpop.f32.mrf.mxu1 }
 0x1b2   :  { %v230_v22 = vmax.f32 %v227_v20, 0.0 }
 0x1b4   :  { %467 = vmatmul.mubr.msk.f32.vlgmr.msra.gmra.mxu0 %vm156_vm2, %v230_v22 }
 0x274   :  { %v308_v27 = vpop.f32.mrf.mxu0 }
 0x275   :  { %v309_v28 = vadd.f32 %v417_v26, %v308_v27 }
 0x276   :  { %v468_v29 = vpop.f32.mrf.mxu0 }
 0x277   :  { %v312_v30 = vmax.f32 %v309_v28, 0.0 }
 0x279   :  { %478 = vmatmul.mubr.msk.f32.vlgmr.msra.gmra.mxu1 %vm156_vm2, %v312_v30 }
 0x339   :  { %v390_v32 = vpop.f32.mrf.mxu1 }
 0x33a   :  { %v391_v33 = vadd.f32 %v419_v31, %v390_v32 }
 0x33b   :  { %v479_v34 = vpop.f32.mrf.mxu1 }
 0x33c   :  { %487 = vtanh.f32 %v391_v33 }
 0x349   :  { %v488_v35 = vpop.eup %487 }
 0x34a   :  { %v421_v36 = vmul.f32 -1.442695, %v488_v35 }
 0x34c   :  { %489 = vpow2.f32 %v421_v36 }
 0x359   :  { %v490_v37 = vpop.eup %489 }
 0x35a   :  { %v401_v38 = vadd.f32 1.0, %v490_v37 }
 0x35c   :  { %491 = vrcp.f32 %v401_v38 }
 0x369   :  { %v492_v41 = vpop.eup %491 }
 0x36a   :  { %v404_v42 = vsel %vm397_vm3, %v488_v35, %v492_v41 }
 0x36b   :  { %406 = vst.msk [vmem:[%s660_s6] sm:$0xff] %vm405_vm4, %v404_v42 }
 0x36c   :  { %411 = vsyncpa [#allocation3], 1 }
 0x36d   :  { %412 = vsyncpa [#allocation5], 1 }

</bundles_post_ra>
